<compile_context>
chip_gen: v7x
topology: tpu7x:2x2x1
jax: 0.10.0
libtpu: 0.0.40
codegen_flags: <defaults>
</compile_context>

<pallas_src>
import jax
import jax.numpy as jnp
from jax.experimental import pallas as pl
from jax.experimental.pallas import tpu as pltpu

LANES = 128
SUBLANES = 8
TILE_BYTES_PER_INPUT = 2 * 1024 * 1024      # ~2 MiB per input tile per buffer
VMEM_LIMIT_BYTES = 32 * 1024 * 1024         # safe on v5e/v6e/v7x physical VMEM


def _num_tensorcores() -> int:
    """Best-effort count of TensorCores this kernel spans (2 on v7x/megacore)."""
    try:
        info = pltpu.get_tpu_info()
        for attr in ("num_cores", "num_tensorcores", "tensorcores_per_chip",
                     "core_count"):
            v = getattr(info, attr, None)
            if isinstance(v, int) and 1 <= v <= 8:
                return v
    except Exception:
        pass
    return 1


def _make_mse_kernel(tile_rows: int, inner: int, valid_rows: int,
                     first_masked: int, needs_mask: bool):
    def _partial_sums(d):
        # (tile_rows, 128) -> (8, 128): pure cross-vreg VPU adds, no XLU.
        return (d * d).reshape(tile_rows // SUBLANES, SUBLANES, LANES).sum(axis=0)

    def kernel(sr_ref, hr_ref, out_ref, acc_ref):
        o = pl.program_id(0)
        i = pl.program_id(1)

        @pl.when(i == 0)
        def _():
            acc_ref[...] = jnp.zeros_like(acc_ref)

        d = sr_ref[...].astype(jnp.float32) - hr_ref[...].astype(jnp.float32)

        if needs_mask:
            logical = o * inner + i          # un-clamped logical tile index

            @pl.when(logical < first_masked)
            def _():
                acc_ref[...] += _partial_sums(d)

            @pl.when(logical >= first_masked)
            def _():
                # Only the ragged last tile and clamped over-shoot tiles land
                # here; zero rows beyond the valid prefix *before* squaring.
                row_ids = logical * tile_rows + jax.lax.broadcasted_iota(
                    jnp.int32, (tile_rows, LANES), 0)
                dm = jnp.where(row_ids < valid_rows, d, 0.0)
                acc_ref[...] += _partial_sums(dm)
        else:
            acc_ref[...] += _partial_sums(d)

        @pl.when(i == pl.num_programs(1) - 1)
        def _():
            out_ref[0, 0] = jnp.sum(acc_ref[...])

    return kernel


def content_loss(sr: jax.Array, hr: jax.Array) -> jax.Array:
    """Equivalent of torch.nn.functional.mse_loss(sr, hr) (mean reduction)."""
    assert sr.shape == hr.shape, "mse_loss requires matching shapes"
    n_elems = sr.size
    out_dtype = jnp.promote_types(sr.dtype, hr.dtype)

    sr_flat = sr.reshape(-1)
    hr_flat = hr.reshape(-1)

    full_rows = n_elems // LANES            # full 128-lane rows -> kernel
    rem = n_elems - full_rows * LANES       # <128-element tail -> JAX glue

    total = jnp.float32(0.0)

    if full_rows > 0:
        main = full_rows * LANES
        # Free reshape when the flat size is lane-aligned (the common case for
        # image tensors); otherwise the prefix slice materializes a copy.
        sr2d = (sr_flat if rem == 0 else sr_flat[:main]).reshape(full_rows, LANES)
        hr2d = (hr_flat if rem == 0 else hr_flat[:main]).reshape(full_rows, LANES)

        # Byte-budget tile sizing: bf16/int8 inputs get 2x/4x the rows of f32.
        itemsize = max(jnp.dtype(sr.dtype).itemsize, jnp.dtype(hr.dtype).itemsize)
        budget_rows = max(
            SUBLANES,
            (TILE_BYTES_PER_INPUT // (LANES * itemsize)) // SUBLANES * SUBLANES)
        padded_rows = pl.cdiv(full_rows, SUBLANES) * SUBLANES
        tile_rows = min(budget_rows, padded_rows)

        n_blocks = pl.cdiv(full_rows, tile_rows)
        last_block = n_blocks - 1

        # Outer "parallel" split only when there really are 2+ TensorCores.
        n_cores = _num_tensorcores()
        n_outer = n_cores if (n_cores > 1 and n_blocks >= n_cores) else 1
        inner = pl.cdiv(n_blocks, n_outer)

        needs_mask = (full_rows % tile_rows != 0) or (n_blocks % n_outer != 0)
        first_masked = full_rows // tile_rows   # tiles >= this need masking

        def in_index_map(o, i):
            # Clamp over-shot blocks of an uneven outer split so the DMA stays
            # in bounds; their contribution is zeroed by the in-kernel mask.
            return (jnp.minimum(o * inner + i, last_block), 0)

        partials = pl.pallas_call(
            _make_mse_kernel(tile_rows, inner, full_rows, first_masked,
                             needs_mask),
            out_shape=jax.ShapeDtypeStruct((n_outer, 1), jnp.float32),
            grid_spec=pltpu.PrefetchScalarGridSpec(
                num_scalar_prefetch=0,
                grid=(n_outer, inner),
                in_specs=[
                    pl.BlockSpec((tile_rows, LANES), in_index_map),
                    pl.BlockSpec((tile_rows, LANES), in_index_map),
                ],
                out_specs=pl.BlockSpec((1, 1), lambda o, i: (o, 0),
                                       memory_space=pltpu.MemorySpace.SMEM),
                scratch_shapes=[pltpu.VMEM((SUBLANES, LANES), jnp.float32)],
            ),
            compiler_params=pltpu.CompilerParams(
                dimension_semantics=("parallel", "arbitrary"),
                vmem_limit_bytes=VMEM_LIMIT_BYTES),
            cost_estimate=pl.CostEstimate(
                flops=3 * main,
                transcendentals=0,
                bytes_accessed=int(main * (jnp.dtype(sr.dtype).itemsize
                                           + jnp.dtype(hr.dtype).itemsize))),
        )(sr2d, hr2d)
        total = total + jnp.sum(partials)

    if rem > 0:
        # <128-element remainder: negligible work, handled in plain JAX glue.
        d_tail = (sr_flat[full_rows * LANES:].astype(jnp.float32)
                  - hr_flat[full_rows * LANES:].astype(jnp.float32))
        total = total + jnp.sum(d_tail * d_tail)

    return (total / jnp.float32(n_elems)).astype(out_dtype)


if __name__ == "__main__":
    key = jax.random.PRNGKey(0)
    k_sr, k_hr = jax.random.split(key)

    # NCHW, small shapes: batch=2, channels=4, spatial=16x16
    sr = jax.random.normal(k_sr, (2, 4, 16, 16), dtype=jnp.float32)
    hr = jax.random.normal(k_hr, (2, 4, 16, 16), dtype=jnp.float32)

    loss = content_loss(sr, hr)
    jax.block_until_ready(loss)

    # sanity check against plain-JAX reference
    ref = jnp.mean((sr - hr) ** 2)
    assert jnp.allclose(loss, ref, rtol=1e-5, atol=1e-6), (loss, ref)

    print("KERNEL_OK")
</pallas_src>

<mosaic_0001>
module attributes {stable_mosaic.version = 11 : i64} {
  func.func @kernel(%arg0: i32, %arg1: i32, %arg2: memref<16x128xf32, #tpu.memory_space<vmem>>, %arg3: memref<16x128xf32, #tpu.memory_space<vmem>>, %arg4: memref<1x1xf32, #tpu.memory_space<smem>>, %arg5: memref<8x128xf32, #tpu.memory_space<vmem>>) attributes {dimension_semantics = [#tpu.dimension_semantics<parallel>, #tpu.dimension_semantics<arbitrary>], iteration_bounds = array<i64: 1, 1>, scalar_prefetch = 0 : i64, scratch_operands = 1 : i64, tpu.core_type = #tpu.core_type<tc>, window_params = [{transform_indices = @transform_0, window_bounds = array<i64: 16, 128>}, {transform_indices = @transform_1, window_bounds = array<i64: 16, 128>}, {transform_indices = @transform_2, window_bounds = array<i64: 1, 1>}]} {
    %c0_i32 = arith.constant 0 : i32
    %0 = arith.cmpi eq, %arg1, %c0_i32 : i32
    %1 = arith.extui %0 : i1 to i32
    %c0_i32_0 = arith.constant 0 : i32
    %2 = arith.cmpi ne, %1, %c0_i32_0 : i32
    scf.if %2 {
      %cst_10 = arith.constant 0.000000e+00 : f32
      %15 = vector.broadcast %cst_10 : f32 to vector<8x128xf32>
      %c0_11 = arith.constant 0 : index
      %c0_12 = arith.constant 0 : index
      %16 = vector.load %arg5[%c0_11, %c0_12] : memref<8x128xf32, #tpu.memory_space<vmem>>, vector<8x128xf32>
      tpu.vector_store %arg5[%c0_11, %c0_12], %15 {strides = array<i32>} : memref<8x128xf32, #tpu.memory_space<vmem>>, vector<8x128xf32>,
    } else {
    }
    %c0 = arith.constant 0 : index
    %c0_1 = arith.constant 0 : index
    %3 = vector.load %arg2[%c0, %c0_1] : memref<16x128xf32, #tpu.memory_space<vmem>>, vector<16x128xf32>
    %c0_2 = arith.constant 0 : index
    %c0_3 = arith.constant 0 : index
    %4 = vector.load %arg3[%c0_2, %c0_3] : memref<16x128xf32, #tpu.memory_space<vmem>>, vector<16x128xf32>
    %5 = arith.subf %3, %4 : vector<16x128xf32>
    %c0_4 = arith.constant 0 : index
    %c0_5 = arith.constant 0 : index
    %6 = vector.load %arg5[%c0_4, %c0_5] : memref<8x128xf32, #tpu.memory_space<vmem>>, vector<8x128xf32>
    %7 = arith.mulf %5, %5 : vector<16x128xf32>
    %8 = vector.shape_cast %7 : vector<16x128xf32> to vector<2x8x128xf32>
    %cst = arith.constant dense<0.000000e+00> : vector<8x128xf32>
    %9 = vector.multi_reduction <add>, %8, %cst [0] : vector<2x8x128xf32> to vector<8x128xf32>
    %10 = arith.addf %6, %9 : vector<8x128xf32>
    %c0_6 = arith.constant 0 : index
    %c0_7 = arith.constant 0 : index
    %11 = vector.load %arg5[%c0_6, %c0_7] : memref<8x128xf32, #tpu.memory_space<vmem>>, vector<8x128xf32>
    tpu.vector_store %arg5[%c0_6, %c0_7], %10 {strides = array<i32>} : memref<8x128xf32, #tpu.memory_space<vmem>>, vector<8x128xf32>,
    %c0_i32_8 = arith.constant 0 : i32
    %12 = arith.cmpi eq, %arg1, %c0_i32_8 : i32
    %13 = arith.extui %12 : i1 to i32
    %c0_i32_9 = arith.constant 0 : i32
    %14 = arith.cmpi ne, %13, %c0_i32_9 : i32
    scf.if %14 {
      %c0_10 = arith.constant 0 : index
      %c0_11 = arith.constant 0 : index
      %15 = vector.load %arg5[%c0_10, %c0_11] : memref<8x128xf32, #tpu.memory_space<vmem>>, vector<8x128xf32>
      %16 = vector.shape_cast %15 : vector<8x128xf32> to vector<1x8x128xf32>
      %cst_12 = arith.constant dense<0.000000e+00> : vector<1xf32>
      %17 = vector.multi_reduction <add>, %16, %cst_12 [1, 2] : vector<1x8x128xf32> to vector<1xf32>
      %18 = vector.shape_cast %17 : vector<1xf32> to vector<1x1x1xf32>
      %19 = vector.extract %18[0, 0, 0] : f32 from vector<1x1x1xf32>
      %c0_13 = arith.constant 0 : index
      %c0_14 = arith.constant 0 : index
      %20 = memref.load %arg4[%c0_13, %c0_14] : memref<1x1xf32, #tpu.memory_space<smem>>
      memref.store %19, %arg4[%c0_13, %c0_14] : memref<1x1xf32, #tpu.memory_space<smem>>
    } else {
    }
    return
  }
  func.func @transform_0(%arg0: i32, %arg1: i32) -> (i32, i32) {
    %c1_i32 = arith.constant 1 : i32
    %0 = arith.muli %arg0, %c1_i32 : i32
    %1 = arith.addi %0, %arg1 : i32
    %c0_i32 = arith.constant 0 : i32
    %2 = arith.minsi %1, %c0_i32 : i32
    %c0_i32_0 = arith.constant 0 : i32
    %c0_i32_1 = arith.constant 0 : i32
    return %2, %c0_i32_0 : i32, i32
  }
  func.func @transform_1(%arg0: i32, %arg1: i32) -> (i32, i32) {
    %c1_i32 = arith.constant 1 : i32
    %0 = arith.muli %arg0, %c1_i32 : i32
    %1 = arith.addi %0, %arg1 : i32
    %c0_i32 = arith.constant 0 : i32
    %2 = arith.minsi %1, %c0_i32 : i32
    %c0_i32_0 = arith.constant 0 : i32
    %c0_i32_1 = arith.constant 0 : i32
    return %2, %c0_i32_0 : i32, i32
  }
  func.func @transform_2(%arg0: i32, %arg1: i32) -> (i32, i32) {
    %c0_i32 = arith.constant 0 : i32
    %c0_i32_0 = arith.constant 0 : i32
    return %arg0, %c0_i32 : i32, i32
  }
}

</mosaic_0001>

<bundles_post_ra>
// kernel: tpu_custom_call.1
= control target key start
LH: loop header
LB: loop body
LE: loop exit
PB: predicated region body
PF: predicated region fallthrough
CT: control target
= control target key end

     0   :  { %7 = vsyncpa [#allocation4], 0  ;;  %s234_s0 = inlined_call_operand.hbm [shape: f32[16,128], index: 0, kind: input, shape index: {}]   ;;  %s235_s1 = inlined_call_operand.hbm [shape: f32[16,128], index: 1, kind: input, shape index: {}]   ;;  %s236_s2 = inlined_call_operand.hbm [shape: f32[1,1], index: 2, kind: output, shape index: {}]  }
   0x1   :  { %8 = vsyncpa [#allocation7], 0 }
   0x2   :  { %9 = vsyncpa [#allocation5], 0  ;;  %s178_s9 = smov [#allocation3]   ;;  %s118_s13 = scalar_lea.hbm %s234_s0, 256 }
   0x3   :  { %s21_s10 = sshll.u32 %s178_s9, 4  ;;  %p119_p0 = scmp.ne.s32.totalorder %s234_s0, %s118_s13  ;;  %s22_s10 = int_to_ptr.vmem [resolvable:$true] %s21_s10 }
   0x4   :  { %p122_p1 = scmp.lt.u32.totalorder %s118_s13, %s234_s0 }
   0x6   :  { %p124_p2 = pnand %p122_p1, %p119_p0 }
   0x8   :  { %127 = shalt.err (!%p124_p2)
}
   0x9   :  { %s128_s18 = scalar_lea.vmem %s22_s10, 256  ;;  %p133_p4 = scmp.lt.s32.totalorder %s22_s10, %s22_s10 }
   0xa   :  { %p129_p3 = scmp.ne.s32.totalorder %s22_s10, %s128_s18  ;;  %p134_p5 = scmp.lt.s32.totalorder %s128_s18, %s128_s18 }
   0xc   :  { %p135_p6 = por %p134_p5, %p133_p4 }
   0xe   :  { %p136_p7 = pnand %p135_p6, %p129_p3 }
  0x10   :  { %139 = shalt.err (!%p136_p7)
}
  0x11   :  { %s179_s19 = smov 128   ;;  %s180_s20 = smov 8  }
  0x12   :  { %27 = dma.hbm_to_vmem [thread:$0]  %s234_s0, 256, %s22_s10, [#allocation4], %s179_s19, %s179_s19, %s180_s20  }
  0x13   :  { %s181_s23 = smov [#allocation6]   ;;  %s140_s27 = scalar_lea.hbm %s235_s1, 256 }
  0x14   :  { %s39_s24 = sshll.u32 %s181_s23, 4  ;;  %p141_p8 = scmp.ne.s32.totalorder %s235_s1, %s140_s27  ;;  %s40_s24 = int_to_ptr.vmem [resolvable:$true] %s39_s24 }
  0x15   :  { %p144_p9 = scmp.lt.u32.totalorder %s140_s27, %s235_s1 }
  0x17   :  { %p146_p10 = pnand %p144_p9, %p141_p8 }
  0x19   :  { %149 = shalt.err (!%p146_p10)
}
  0x1a   :  { %s150_s4 = scalar_lea.vmem %s40_s24, 256  ;;  %p155_p12 = scmp.lt.s32.totalorder %s40_s24, %s40_s24 }
  0x1b   :  { %p151_p11 = scmp.ne.s32.totalorder %s40_s24, %s150_s4  ;;  %p156_p13 = scmp.lt.s32.totalorder %s150_s4, %s150_s4 }
  0x1d   :  { %p157_p0 = por %p156_p13, %p155_p12 }
  0x1f   :  { %p158_p1 = pnand %p157_p0, %p151_p11 }
  0x21   :  { %161 = shalt.err (!%p158_p1)
}
  0x22   :  { %45 = dma.hbm_to_vmem [thread:$0]  %s235_s1, 256, %s40_s24, [#allocation7], %s179_s19, %s179_s19, %s180_s20  }
  0x23   :  { %172 = dma.done.wait [#allocation4], 256  }
  0x24   :  { %173 = vsyncadd [#allocation4], 4294967040 }
  0x25   :  { %174 = dma.done.wait [#allocation7], 256  }
  0x26   :  { %175 = vsyncadd [#allocation7], 4294967040  ;;  %v65_v0 = vld [vmem:[#allocation3] sm:$0xff]  ;;  %v66_v1 = vld [vmem:[#allocation3 + $0x8] sm:$0xff]  ;;  %s162_s8 = scalar_lea.hbm %s236_s2, 16 }
  0x27   :  { %v67_v2 = vld [vmem:[#allocation6] sm:$0xff]  ;;  %v68_v3 = vld [vmem:[#allocation6 + $0x8] sm:$0xff]  ;;  %p163_p2 = scmp.ne.s32.totalorder %s236_s2, %s162_s8  ;;  %p166_p3 = scmp.lt.u32.totalorder %s162_s8, %s236_s2 }
  0x28   :  { %v69_v4 = vsub.f32 %v65_v0, %v67_v2  ;;  %v70_v5 = vsub.f32 %v66_v1, %v68_v3 }
  0x29   :  { %p168_p4 = pnand %p166_p3, %p163_p2 }
  0x2a   :  { %v72_v6 = vmul.f32 %v69_v4, %v69_v4  ;;  %v73_v7 = vmul.f32 %v70_v5, %v70_v5 }
  0x2c   :  { %v74_v8 = vadd.f32 %v73_v7, %v72_v6 }
  0x2e   :  { %81 = vadd.xlane.f32.xlu0 %v74_v8 }
  0xbb   :  { %v82_v9 = vpop.xlane.xlu0 %81 }
  0xbc   :  { %v83_v10 = vrot.slane %v82_v9, 4 }
  0xbe   :  { %v84_v11 = vadd.f32 %v83_v10, %v82_v9 }
  0xc0   :  { %v85_v12 = vrot.slane %v84_v11, 2 }
  0xc2   :  { %v86_v13 = vadd.f32 %v85_v12, %v84_v11 }
  0xc4   :  { %v87_v14 = vrot.slane %v86_v13, 1 }
  0xc6   :  { %v88_v15 = vadd.f32 %v87_v14, %v86_v13 }
  0xc8   :  { %111 = vpush %v88_v15 }
  0xf9   :  { %s112_s1 = spop %111 }
  0xfa   :  { %91 = sst [smem:[#allocation8]] %s112_s1 }
  0xfb   :  { %171 = shalt.err (!%p168_p4)
}
  0xfc   :  { %s182_s13 = smov [#allocation8]  }
  0xfd   :  { %99 = dma.smem_to_hbm %s182_s13, 16, %s236_s2, [#allocation5]  }
  0xfe   :  { %176 = dma.done.wait [#allocation5], 16  }
  0xff   :  { %177 = vsyncadd [#allocation5], 4294967280 }
 0x100   :  { %103 = sfence }
 0x101   :  { %104 = vsyncpa [#allocation4], 1 }
 0x102   :  { %105 = vsyncpa [#allocation7], 1 }
 0x103   :  { %106 = vsyncpa [#allocation5], 1 }

</bundles_post_ra>
